<compile_context>
chip_gen: v6e
topology: v6e:2x2x1
jax: 0.10.0
libtpu: 0.0.40
codegen_flags: <defaults>
</compile_context>

<pallas_src>
import functools
import math

import jax
import jax.numpy as jnp
from jax import lax
from jax.experimental import pallas as pl
from jax.experimental.pallas import tpu as pltpu


def _round_up(x, m):
    return (x + m - 1) // m * m


def _pick_tm(M, tm_target):
    """Lane tile for the matmul M axis: a multiple of 128 (or the full extent),
    dividing M when possible (avoids pad + post-slice copy), preferring >=2 tiles so
    both v7x TensorCores get work on the 'parallel' M axis."""
    tm_target = max(128, tm_target // 128 * 128)
    if M <= tm_target:
        if M <= 128 or M % 128 != 0:
            return M, M                                   # single full-extent block
        divs = [t for t in range(128, M, 128) if M % t == 0]
        return (max(divs), M) if divs else (M, M)
    divs = [t for t in range(128, tm_target + 1, 128) if M % t == 0]
    if divs:
        return max(divs), M
    return tm_target, _round_up(M, tm_target)             # rare: pad + final slice


# --------------------- fused conv + complex-combine matmul ----------------------

def _conv_matmul_kernel(x_ref, w_ref, b_ref, o_ref):
    """Single-K-tile path: o = (W @ X + b) in one shot (no accumulator scratch)."""
    o_ref[...] = (jnp.dot(w_ref[...], x_ref[...],
                          preferred_element_type=jnp.float32)
                  + b_ref[...]).astype(o_ref.dtype)


def _conv_matmul_acc_kernel(x_ref, w_ref, b_ref, o_ref, acc_ref):
    """Multi-K-tile fallback with a resident f32 accumulator."""
    k = pl.program_id(1)

    @pl.when(k == 0)
    def _init():
        acc_ref[...] = jnp.zeros_like(acc_ref)

    acc_ref[...] += jnp.dot(w_ref[...], x_ref[...],
                            preferred_element_type=jnp.float32)

    @pl.when(k == pl.num_programs(1) - 1)
    def _finalize():
        o_ref[...] = (acc_ref[...] + b_ref[...]).astype(o_ref.dtype)


def fused_conv_matmul(x_cat, w_blk, b_blk, *, tm_target=8192, tk_target=2048,
                      vmem_budget=16 * 1024 * 1024):
    """Y = w_blk @ x_cat + b_blk, bf16 output, lane-dense M axis.

    x_cat: (2K, M) bf16  -- [real patches; imag patches] im2col, M = B*Ho*Wo
    w_blk: (N, 2K) bf16  -- block weights [[Wr, -Wi], [Wi, Wr]], N = 2*C2
    b_blk: (N, 1)  f32
    returns (N, M) bf16  -- rows [0:C2) real, [C2:2*C2) imag
    """
    K2, M = x_cat.shape
    N = w_blk.shape[0]

    # Cap the lane tile so double-buffered bf16 in/out blocks stay well inside the
    # scoped-VMEM limit on every generation (v5e 16 MiB default, v7x 32/64 MiB).
    bytes_per_col = 4 * (K2 + N)
    tm_cap = max(128, (vmem_budget // bytes_per_col) // 128 * 128)
    tm, Mp = _pick_tm(M, min(tm_target, tm_cap))
    if Mp != M:
        x_cat = jnp.pad(x_cat, ((0, 0), (0, Mp - M)))

    cparams = pltpu.CompilerParams(
        dimension_semantics=("parallel",),
        vmem_limit_bytes=32 * 1024 * 1024)

    if K2 <= tk_target:
        # Normal case: one K tile -> no accumulator, no reduction grid axis.
        out = pl.pallas_call(
            _conv_matmul_kernel,
            out_shape=jax.ShapeDtypeStruct((N, Mp), jnp.bfloat16),
            grid=(Mp // tm,),
            in_specs=[
                pl.BlockSpec((K2, tm), lambda m: (0, m)),
                pl.BlockSpec((N, K2), lambda m: (0, 0)),
                pl.BlockSpec((N, 1), lambda m: (0, 0)),
            ],
            out_specs=pl.BlockSpec((N, tm), lambda m: (0, m)),
            compiler_params=cparams,
        )(x_cat, w_blk, b_blk)
    else:
        tk = max(128, tk_target // 128 * 128)
        Kp = _round_up(K2, tk)
        if Kp != K2:
            x_cat = jnp.pad(x_cat, ((0, Kp - K2), (0, 0)))
            w_blk = jnp.pad(w_blk, ((0, 0), (0, Kp - K2)))
        out = pl.pallas_call(
            _conv_matmul_acc_kernel,
            out_shape=jax.ShapeDtypeStruct((N, Mp), jnp.bfloat16),
            grid=(Mp // tm, Kp // tk),
            in_specs=[
                pl.BlockSpec((tk, tm), lambda m, k: (k, m)),
                pl.BlockSpec((N, tk), lambda m, k: (0, k)),
                pl.BlockSpec((N, 1), lambda m, k: (0, 0)),
            ],
            out_specs=pl.BlockSpec((N, tm), lambda m, k: (0, m)),
            scratch_shapes=[pltpu.VMEM((N, tm), jnp.float32)],
            compiler_params=pltpu.CompilerParams(
                dimension_semantics=("parallel", "arbitrary"),
                vmem_limit_bytes=32 * 1024 * 1024),
        )(x_cat, w_blk, b_blk)

    if Mp != M:
        out = out[:, :M]            # only when M could not be tiled lane-aligned
    return out


# ---------------------- fused GroupNorm(1) + PReLU (real+imag) -------------------

def _gn_prelu_kernel(x_ref, g_ref, b_ref, a_ref, o_ref, *, eps):
    """One source (real or imag) per grid step, native (C2, B, HW) layout.
    Per-batch GroupNorm(1 group) stats in f32 from the bf16 conv output, then the
    per-channel affine and PReLU."""
    x = x_ref[...].astype(jnp.float32)                          # (C2, B, HW)
    cnt = x.shape[0] * x.shape[2]
    mean = jnp.sum(jnp.sum(x, axis=2, keepdims=True),
                   axis=0, keepdims=True) / cnt                 # (1, B, 1)
    d = x - mean
    var = jnp.sum(jnp.sum(d * d, axis=2, keepdims=True),
                  axis=0, keepdims=True) / cnt                  # centered: no cancellation
    y = d * lax.rsqrt(var + eps) * g_ref[...] + b_ref[...]      # (C2,1,1) affine bcast
    a = a_ref[...]                                              # (1,1,1) PReLU alpha
    o_ref[...] = jnp.where(y > 0.0, y, a * y)


def groupnorm_prelu_fused(y, gamma, beta, alpha, eps=1e-8):
    """y: (2*C2, B, HW) bf16 (matmul-native layout; rows [0:C2) real, [C2:) imag).
    gamma/beta: (2*C2,) per pre-shuffle channel; alpha: (2,) per source.
    Returns (2*C2, B, HW) f32."""
    C2x2, B, HW = y.shape
    C2 = C2x2 // 2
    return pl.pallas_call(
        functools.partial(_gn_prelu_kernel, eps=eps),
        out_shape=jax.ShapeDtypeStruct((C2x2, B, HW), jnp.float32),
        grid=(2,),
        in_specs=[
            pl.BlockSpec((C2, B, HW), lambda s: (s, 0, 0)),
            pl.BlockSpec((C2, 1, 1), lambda s: (s, 0, 0)),
            pl.BlockSpec((C2, 1, 1), lambda s: (s, 0, 0)),
            pl.BlockSpec((1, 1, 1), lambda s: (s, 0, 0)),
        ],
        out_specs=pl.BlockSpec((C2, B, HW), lambda s: (s, 0, 0)),
        compiler_params=pltpu.CompilerParams(dimension_semantics=("parallel",)),
    )(y,
      gamma.reshape(C2x2, 1, 1).astype(jnp.float32),
      beta.reshape(C2x2, 1, 1).astype(jnp.float32),
      alpha.reshape(2, 1, 1).astype(jnp.float32))


# ------------------------------ im2col (causal) ----------------------------------

def _im2col_causal(x, KH=3, KW=2, pad_h=1, pad_w_left=1):
    """causalConv2d(k=(3,2), padding=(1,1)) patches, transposed: (Cin*KH*KW, B*Ho*Wo)."""
    B, Cin, H, W = x.shape
    xp = jnp.pad(x, ((0, 0), (0, 0), (pad_h, pad_h), (pad_w_left, 0)))
    cols = [xp[:, :, kh:kh + H, kw:kw + W]
            for kh in range(KH) for kw in range(KW)]            # each (B, Cin, H, W)
    pat = jnp.stack(cols, axis=2)                               # (B, Cin, KH*KW, H, W)
    pat = jnp.transpose(pat, (1, 2, 0, 3, 4))                   # (Cin, KH*KW, B, H, W)
    return pat.reshape(Cin * KH * KW, B * H * W)


# ------------------------------- CSPCONV forward ---------------------------------

def cspconv_forward(p, real_x, imag_x, scale_factor=2):
    B, Cin, H, W = real_x.shape
    C2, _, KH, KW = p['w_r'].shape                 # C2 = out_ch * scale_factor
    n = scale_factor
    out_ch = C2 // n
    K = Cin * KH * KW
    HW = H * W

    # (1) all four causal convs + complex combine as ONE bf16 matmul:
    #     [[Wr, -Wi], [Wi, Wr]] (2*C2, 2K)  @  [Xr; Xi] (2K, M),  M = B*H*W
    x_cat = jnp.concatenate([_im2col_causal(real_x, KH, KW),
                             _im2col_causal(imag_x, KH, KW)],
                            axis=0).astype(jnp.bfloat16)
    Wr = p['w_r'].reshape(C2, K)
    Wi = p['w_i'].reshape(C2, K)
    w_blk = jnp.concatenate(
        [jnp.concatenate([Wr, -Wi], axis=1),
         jnp.concatenate([Wi, Wr], axis=1)], axis=0).astype(jnp.bfloat16)
    b_blk = jnp.concatenate([p['b_r'] - p['b_i'],
                             p['b_r'] + p['b_i']]).reshape(2 * C2, 1).astype(jnp.float32)

    y = fused_conv_matmul(x_cat, w_blk, b_blk)       # (2*C2, B*HW) bf16: [real; imag]

    # (2) GroupNorm(1) + PReLU on the matmul-native (channels, B*HW) layout.
    #     GN stats are invariant under the sub-pixel shuffle, so gamma/beta are
    #     repeated per phase and applied pre-shuffle; real+imag fused in one call.
    g_all = jnp.concatenate([jnp.repeat(p['ln_r_w'], n), jnp.repeat(p['ln_i_w'], n)])
    bt_all = jnp.concatenate([jnp.repeat(p['ln_r_b'], n), jnp.repeat(p['ln_i_b'], n)])
    a_all = jnp.stack([p['alpha_r'], p['alpha_i']])
    gn = groupnorm_prelu_fused(y.reshape(2 * C2, B, HW), g_all, bt_all, a_all)

    # (3) sub-pixel shuffle: out[b, c1, h*n + k, w] = gn[src, c1*n + k, b, h*W + w]
    #     (pure reindex glue, one XLA transpose of the final outputs).
    g6 = gn.reshape(2, out_ch, n, B, H, W)
    out = jnp.transpose(g6, (0, 3, 1, 4, 2, 5)).reshape(2, B, out_ch, H * n, W)
    return out[0], out[1]


# --------------------------------- parameters ------------------------------------

def init_cspconv_params(in_ch, out_ch, key, scale_factor=2):
    k1, k2, k3, k4 = jax.random.split(key, 4)
    c2 = out_ch * scale_factor
    bound = 1.0 / math.sqrt(in_ch * 3 * 2)

    def conv_init(kw_, kb_):
        w = jax.random.uniform(kw_, (c2, in_ch, 3, 2), jnp.float32, -bound, bound)
        b = jax.random.uniform(kb_, (c2,), jnp.float32, -bound, bound)
        return w, b

    w_r, b_r = conv_init(k1, k2)
    w_i, b_i = conv_init(k3, k4)
    return dict(
        w_r=w_r, b_r=b_r, w_i=w_i, b_i=b_i,
        ln_r_w=jnp.ones((out_ch,), jnp.float32), ln_r_b=jnp.zeros((out_ch,), jnp.float32),
        ln_i_w=jnp.ones((out_ch,), jnp.float32), ln_i_b=jnp.zeros((out_ch,), jnp.float32),
        alpha_r=jnp.float32(0.25), alpha_i=jnp.float32(0.25))


# --------------------------- pure-JAX reference (f32) ----------------------------

def cspconv_reference(p, real_x, imag_x, scale_factor=2, eps=1e-8):
    n = scale_factor

    def cconv(x, w, b):
        xp = jnp.pad(x, ((0, 0), (0, 0), (0, 0), (1, 0)))       # causal left pad on W
        y = lax.conv_general_dilated(
            xp, w, window_strides=(1, 1), padding=[(1, 1), (0, 0)],
            dimension_numbers=('NCHW', 'OIHW', 'NCHW'),
            precision=lax.Precision.HIGHEST)
        return y + b[None, :, None, None]

    r2r = cconv(real_x, p['w_r'], p['b_r'])
    r2i = cconv(real_x, p['w_i'], p['b_i'])
    i2i = cconv(imag_x, p['w_i'], p['b_i'])
    i2r = cconv(imag_x, p['w_r'], p['b_r'])
    real, imag = r2r - i2i, r2i + i2r

    def shuffle(t):  # exact torch permute/reshape sequence
        B, C2, H, W = t.shape
        t = jnp.transpose(t, (0, 3, 2, 1)).reshape(B, W, H, C2 // n, n)
        t = jnp.transpose(t, (0, 1, 2, 4, 3)).reshape(B, W, H * n, C2 // n)
        return jnp.transpose(t, (0, 3, 2, 1))

    def gn_prelu(t, g, b, a):
        m = jnp.mean(t, axis=(1, 2, 3), keepdims=True)
        v = jnp.mean((t - m) ** 2, axis=(1, 2, 3), keepdims=True)
        y = (t - m) * lax.rsqrt(v + eps) * g[None, :, None, None] + b[None, :, None, None]
        return jnp.where(y > 0.0, y, a * y)

    return (gn_prelu(shuffle(real), p['ln_r_w'], p['ln_r_b'], p['alpha_r']),
            gn_prelu(shuffle(imag), p['ln_i_w'], p['ln_i_b'], p['alpha_i']))


# ------------------------------------- main ---------------------------------------

if __name__ == "__main__":
    key = jax.random.PRNGKey(0)
    pk, rk, ik = jax.random.split(key, 3)

    B, in_ch, out_ch, H, W = 2, 8, 4, 16, 8            # small demo shapes
    params = init_cspconv_params(in_ch, out_ch, pk)
    real_x = jax.random.normal(rk, (B, in_ch, H, W), jnp.float32)
    imag_x = jax.random.normal(ik, (B, in_ch, H, W), jnp.float32)

    fwd = jax.jit(cspconv_forward)
    out_r, out_i = jax.block_until_ready(fwd(params, real_x, imag_x))

    assert out_r.shape == (B, out_ch, 2 * H, W)
    assert out_i.shape == (B, out_ch, 2 * H, W)
    assert bool(jnp.all(jnp.isfinite(out_r))) and bool(jnp.all(jnp.isfinite(out_i)))

    # correctness vs. f32 reference (bf16 MXU operands + bf16 conv output -> relaxed tol)
    ref_r, ref_i = cspconv_reference(params, real_x, imag_x)
    tol = dict(atol=7.5e-2, rtol=7.5e-2)
    assert jnp.allclose(out_r, ref_r, **tol), float(jnp.max(jnp.abs(out_r - ref_r)))
    assert jnp.allclose(out_i, ref_i, **tol), float(jnp.max(jnp.abs(out_i - ref_i)))

    print("KERNEL_OK")
</pallas_src>

<mosaic_0001>
module attributes {stable_mosaic.version = 11 : i64} {
  func.func @_conv_matmul_kernel(%arg0: i32, %arg1: memref<96x128xbf16, #tpu.memory_space<vmem>>, %arg2: memref<16x96xbf16, #tpu.memory_space<vmem>>, %arg3: memref<16x1xf32, #tpu.memory_space<vmem>>, %arg4: memref<16x128xbf16, #tpu.memory_space<vmem>>) attributes {dimension_semantics = [#tpu.dimension_semantics<parallel>], iteration_bounds = array<i64: 2>, scalar_prefetch = 0 : i64, scratch_operands = 0 : i64, tpu.core_type = #tpu.core_type<tc>, window_params = [{transform_indices = @transform_0, window_bounds = array<i64: 96, 128>}, {pipeline_mode = #tpu.pipeline_mode<synchronous>, transform_indices = @transform_1, window_bounds = array<i64: 16, 96>}, {pipeline_mode = #tpu.pipeline_mode<synchronous>, transform_indices = @transform_2, window_bounds = array<i64: 16, 1>}, {transform_indices = @transform_3, window_bounds = array<i64: 16, 128>}]} {
    %c0 = arith.constant 0 : index
    %c0_0 = arith.constant 0 : index
    %0 = vector.load %arg2[%c0, %c0_0] : memref<16x96xbf16, #tpu.memory_space<vmem>>, vector<16x96xbf16>
    %c0_1 = arith.constant 0 : index
    %c0_2 = arith.constant 0 : index
    %1 = vector.load %arg1[%c0_1, %c0_2] : memref<96x128xbf16, #tpu.memory_space<vmem>>, vector<96x128xbf16>
    %cst = arith.constant dense<0.000000e+00> : vector<16x128xf32>
    %2 = tpu.matmul %0, %1, %cst {dimension_numbers = #tpu.dot_dimension_numbers<[1], [0], [0], [1], [0, 0, 1, 1], [], []>} : vector<16x96xbf16>, vector<96x128xbf16>, vector<16x128xf32> -> vector<16x128xf32>
    %c0_3 = arith.constant 0 : index
    %c0_4 = arith.constant 0 : index
    %3 = vector.load %arg3[%c0_3, %c0_4] : memref<16x1xf32, #tpu.memory_space<vmem>>, vector<16x1xf32>
    %4 = vector.broadcast %3 : vector<16x1xf32> to vector<16x128xf32>
    %5 = arith.addf %2, %4 : vector<16x128xf32>
    %6 = arith.truncf %5 : vector<16x128xf32> to vector<16x128xbf16>
    %c0_5 = arith.constant 0 : index
    %c0_6 = arith.constant 0 : index
    %7 = vector.load %arg4[%c0_5, %c0_6] : memref<16x128xbf16, #tpu.memory_space<vmem>>, vector<16x128xbf16>
    tpu.vector_store %arg4[%c0_5, %c0_6], %6 {strides = array<i32>} : memref<16x128xbf16, #tpu.memory_space<vmem>>, vector<16x128xbf16>,
    return
  }
  func.func @transform_0(%arg0: i32) -> (i32, i32) {
    %c0_i32 = arith.constant 0 : i32
    %c0_i32_0 = arith.constant 0 : i32
    return %c0_i32, %arg0 : i32, i32
  }
  func.func @transform_1(%arg0: i32) -> (i32, i32) {
    %c0_i32 = arith.constant 0 : i32
    %c0_i32_0 = arith.constant 0 : i32
    %c0_i32_1 = arith.constant 0 : i32
    return %c0_i32, %c0_i32_0 : i32, i32
  }
  func.func @transform_2(%arg0: i32) -> (i32, i32) {
    %c0_i32 = arith.constant 0 : i32
    %c0_i32_0 = arith.constant 0 : i32
    %c0_i32_1 = arith.constant 0 : i32
    return %c0_i32, %c0_i32_0 : i32, i32
  }
  func.func @transform_3(%arg0: i32) -> (i32, i32) {
    %c0_i32 = arith.constant 0 : i32
    %c0_i32_0 = arith.constant 0 : i32
    return %c0_i32, %arg0 : i32, i32
  }
}

module attributes {stable_mosaic.version = 11 : i64} {
  func.func @_gn_prelu_kernel(%arg0: i32, %arg1: memref<8x2x128xbf16, #tpu.memory_space<vmem>>, %arg2: memref<8x1x1xf32, #tpu.memory_space<vmem>>, %arg3: memref<8x1x1xf32, #tpu.memory_space<vmem>>, %arg4: memref<1x1x1xf32, #tpu.memory_space<vmem>>, %arg5: memref<8x2x128xf32, #tpu.memory_space<vmem>>) attributes {dimension_semantics = [#tpu.dimension_semantics<parallel>], iteration_bounds = array<i64: 2>, scalar_prefetch = 0 : i64, scratch_operands = 0 : i64, tpu.core_type = #tpu.core_type<tc>, window_params = [{transform_indices = @transform_0, window_bounds = array<i64: 8, 2, 128>}, {transform_indices = @transform_1, window_bounds = array<i64: 8, 1, 1>}, {transform_indices = @transform_2, window_bounds = array<i64: 8, 1, 1>}, {transform_indices = @transform_3, window_bounds = array<i64: 1, 1, 1>}, {transform_indices = @transform_4, window_bounds = array<i64: 8, 2, 128>}]} {
    %c0 = arith.constant 0 : index
    %c0_0 = arith.constant 0 : index
    %c0_1 = arith.constant 0 : index
    %0 = vector.load %arg1[%c0, %c0_0, %c0_1] : memref<8x2x128xbf16, #tpu.memory_space<vmem>>, vector<8x2x128xbf16>
    %1 = arith.extf %0 : vector<8x2x128xbf16> to vector<8x2x128xf32>
    %cst = arith.constant dense<0.000000e+00> : vector<8x2xf32>
    %2 = vector.multi_reduction <add>, %1, %cst [2] : vector<8x2x128xf32> to vector<8x2xf32>
    %3 = vector.shape_cast %2 : vector<8x2xf32> to vector<8x2x1xf32>
    %cst_2 = arith.constant dense<0.000000e+00> : vector<2x1xf32>
    %4 = vector.multi_reduction <add>, %3, %cst_2 [0] : vector<8x2x1xf32> to vector<2x1xf32>
    %5 = vector.shape_cast %4 : vector<2x1xf32> to vector<1x2x1xf32>
    %cst_3 = arith.constant 1.024000e+03 : f32
    %6 = vector.broadcast %cst_3 : f32 to vector<1x2x1xf32>
    %7 = arith.divf %5, %6 : vector<1x2x1xf32>
    %8 = vector.broadcast %7 : vector<1x2x1xf32> to vector<8x2x128xf32>
    %9 = arith.subf %1, %8 : vector<8x2x128xf32>
    %10 = arith.mulf %9, %9 : vector<8x2x128xf32>
    %cst_4 = arith.constant dense<0.000000e+00> : vector<8x2xf32>
    %11 = vector.multi_reduction <add>, %10, %cst_4 [2] : vector<8x2x128xf32> to vector<8x2xf32>
    %12 = vector.shape_cast %11 : vector<8x2xf32> to vector<8x2x1xf32>
    %cst_5 = arith.constant dense<0.000000e+00> : vector<2x1xf32>
    %13 = vector.multi_reduction <add>, %12, %cst_5 [0] : vector<8x2x1xf32> to vector<2x1xf32>
    %14 = vector.shape_cast %13 : vector<2x1xf32> to vector<1x2x1xf32>
    %cst_6 = arith.constant 1.024000e+03 : f32
    %15 = vector.broadcast %cst_6 : f32 to vector<1x2x1xf32>
    %16 = arith.divf %14, %15 : vector<1x2x1xf32>
    %cst_7 = arith.constant 9.99999993E-9 : f32
    %17 = vector.broadcast %cst_7 : f32 to vector<1x2x1xf32>
    %18 = arith.addf %16, %17 : vector<1x2x1xf32>
    %19 = math.rsqrt %18 : vector<1x2x1xf32>
    %20 = vector.broadcast %19 : vector<1x2x1xf32> to vector<8x2x128xf32>
    %21 = arith.mulf %9, %20 : vector<8x2x128xf32>
    %c0_8 = arith.constant 0 : index
    %c0_9 = arith.constant 0 : index
    %c0_10 = arith.constant 0 : index
    %22 = vector.load %arg2[%c0_8, %c0_9, %c0_10] : memref<8x1x1xf32, #tpu.memory_space<vmem>>, vector<8x1x1xf32>
    %23 = vector.broadcast %22 : vector<8x1x1xf32> to vector<8x2x128xf32>
    %24 = arith.mulf %21, %23 : vector<8x2x128xf32>
    %c0_11 = arith.constant 0 : index
    %c0_12 = arith.constant 0 : index
    %c0_13 = arith.constant 0 : index
    %25 = vector.load %arg3[%c0_11, %c0_12, %c0_13] : memref<8x1x1xf32, #tpu.memory_space<vmem>>, vector<8x1x1xf32>
    %26 = vector.broadcast %25 : vector<8x1x1xf32> to vector<8x2x128xf32>
    %27 = arith.addf %24, %26 : vector<8x2x128xf32>
    %c0_14 = arith.constant 0 : index
    %c0_15 = arith.constant 0 : index
    %c0_16 = arith.constant 0 : index
    %28 = vector.load %arg4[%c0_14, %c0_15, %c0_16] : memref<1x1x1xf32, #tpu.memory_space<vmem>>, vector<1x1x1xf32>
    %cst_17 = arith.constant 0.000000e+00 : f32
    %29 = vector.broadcast %cst_17 : f32 to vector<8x2x128xf32>
    %30 = arith.cmpf ogt, %27, %29 : vector<8x2x128xf32>
    %31 = vector.broadcast %28 : vector<1x1x1xf32> to vector<8x2x128xf32>
    %32 = arith.mulf %31, %27 : vector<8x2x128xf32>
    %33 = arith.select %30, %27, %32 : vector<8x2x128xi1>, vector<8x2x128xf32>
    %c0_18 = arith.constant 0 : index
    %c0_19 = arith.constant 0 : index
    %c0_20 = arith.constant 0 : index
    %34 = vector.load %arg5[%c0_18, %c0_19, %c0_20] : memref<8x2x128xf32, #tpu.memory_space<vmem>>, vector<8x2x128xf32>
    tpu.vector_store %arg5[%c0_18, %c0_19, %c0_20], %33 {strides = array<i32>} : memref<8x2x128xf32, #tpu.memory_space<vmem>>, vector<8x2x128xf32>,
    return
  }
  func.func @transform_0(%arg0: i32) -> (i32, i32, i32) {
    %c0_i32 = arith.constant 0 : i32
    %c0_i32_0 = arith.constant 0 : i32
    %c0_i32_1 = arith.constant 0 : i32
    return %arg0, %c0_i32, %c0_i32_0 : i32, i32, i32
  }
  func.func @transform_1(%arg0: i32) -> (i32, i32, i32) {
    %c0_i32 = arith.constant 0 : i32
    %c0_i32_0 = arith.constant 0 : i32
    %c0_i32_1 = arith.constant 0 : i32
    return %arg0, %c0_i32, %c0_i32_0 : i32, i32, i32
  }
  func.func @transform_2(%arg0: i32) -> (i32, i32, i32) {
    %c0_i32 = arith.constant 0 : i32
    %c0_i32_0 = arith.constant 0 : i32
    %c0_i32_1 = arith.constant 0 : i32
    return %arg0, %c0_i32, %c0_i32_0 : i32, i32, i32
  }
  func.func @transform_3(%arg0: i32) -> (i32, i32, i32) {
    %c0_i32 = arith.constant 0 : i32
    %c0_i32_0 = arith.constant 0 : i32
    %c0_i32_1 = arith.constant 0 : i32
    return %arg0, %c0_i32, %c0_i32_0 : i32, i32, i32
  }
  func.func @transform_4(%arg0: i32) -> (i32, i32, i32) {
    %c0_i32 = arith.constant 0 : i32
    %c0_i32_0 = arith.constant 0 : i32
    %c0_i32_1 = arith.constant 0 : i32
    return %arg0, %c0_i32, %c0_i32_0 : i32, i32, i32
  }
}

</mosaic_0001>

<bundles_post_ra>
// kernel: cspconv_forward.2
= control target key start
LH: loop header
LB: loop body
LE: loop exit
PB: predicated region body
PF: predicated region fallthrough
CT: control target
= control target key end

     0   :  { %s620_s12 = smov 0   ;;  %s622_s13 = smov 0   ;;  %s693_s0 = inlined_call_operand.vmem [shape: bf16[96,256], index: 0, kind: input, shape index: {}]   ;;  %s694_s1 = inlined_call_operand.vmem [shape: bf16[16,96], index: 1, kind: input, shape index: {}]   ;;  %s695_s2 = inlined_call_operand.vmem [shape: f32[16,1], index: 2, kind: input, shape index: {}]   ;;  %s696_s3 = inlined_call_operand.vmem [shape: bf16[16,256], index: 3, kind: output, shape index: {}]  }
   0x1   :  { %s624_s14 = smov 0  }
   0x2 LB: > { %s485_s15 = sadd.s32 4294967295, %s595_s14   ;;  %s637_s16 = sadd.s32 1, %s595_s14   ;;  %s595_s14 = sphi %s624_s14, %s700_s14   ;;  %s591_s13 = sphi %s622_s13, %s699_s13   ;;  %s587_s12 = sphi %s620_s12, %s698_s12  }
   0x3   : > { %s17_s17 = ssub.s32 %s595_s14, %s637_s16  ;;  %s20_s18 = sadd.s32 1, %s591_s13 }
   0x4   : > { %p18_p0 = scmp.eq.s32.totalorder %s17_s17, 0  ;;  %p27_p1 = scmp.ne.s32.totalorder %s591_s13, %s587_s12 }
   0x5   : > { %p28_p2 = scmp.eq.s32.totalorder %s595_s14, 0  ;;  %p99_p3 = scmp.eq.s32.totalorder %s485_s15, 1 }
   0x6   : > { %s648_s19 = scalar_select %p18_p0, %s591_s13, %s20_s18  }
   0x7   : > { %p29_p4 = por %p28_p2, %p27_p1  ;;  %p650_p5 = por %p99_p3, %p27_p1 }
   0x8   : > { %p488_p6 = scmp.ge.s32.totalorder %s595_s14, 2 }
   0xa   : > { %127 = sbr.rel (%p488_p6) target bundleno = 27 (0x1b), region = 24 }
   0xf   : > { %130 = sbr.rel (!%p29_p4) target bundleno = 27 (0x1b), region = 28  ;;  %s132_s21 = sand.u32 (%p29_p4), 1, %s591_s13  }
  0x10   : > { %s489_s22 = sshll.u32 (%p29_p4), %s595_s14, 2  ;;  %s536_s23 = smul.u32 (%p29_p4), 48, %s132_s21 }
  0x11   : > { %s136_s26 = scalar_lea.vmem (%p29_p4), %s693_s0, %s489_s22 }
  0x12   : > { %v153_v0 = vld [vmem:[%s136_s26] sm:$0xf] (%p29_p4)  ;;  %v155_v1 = vld [vmem:[%s136_s26 + $0x8] sm:$0xf] (%p29_p4)  ;;  %v157_v2 = vld [vmem:[%s136_s26 + $0x10] sm:$0xf] (%p29_p4) }
  0x13   : > { %v159_v3 = vld [vmem:[%s136_s26 + $0x18] sm:$0xf] (%p29_p4)  ;;  %v161_v4 = vld [vmem:[%s136_s26 + $0x20] sm:$0xf] (%p29_p4)  ;;  %s134_s27 = scalar_lea.vmem (%p29_p4), [#allocation2], %s536_s23 }
  0x14   : > { %154 = vst [vmem:[%s134_s27] sm:$0xf] %v153_v0  ;;  %156 = vst [vmem:[%s134_s27 + $0x4] sm:$0xf] %v155_v1  ;;  %v163_v5 = vld [vmem:[%s136_s26 + $0x28] sm:$0xf] }
  0x15   : > { %158 = vst [vmem:[%s134_s27 + $0x8] sm:$0xf] %v157_v2  ;;  %160 = vst [vmem:[%s134_s27 + $0xc] sm:$0xf] %v159_v3  ;;  %v165_v6 = vld [vmem:[%s136_s26 + $0x30] sm:$0xf] }
  0x16   : > { %162 = vst [vmem:[%s134_s27 + $0x10] sm:$0xf] %v161_v4  ;;  %v167_v7 = vld [vmem:[%s136_s26 + $0x38] sm:$0xf]  ;;  %164 = vst [vmem:[%s134_s27 + $0x14] sm:$0xf] %v163_v5 }
  0x17   : > { %166 = vst [vmem:[%s134_s27 + $0x18] sm:$0xf] %v165_v6  ;;  %168 = vst [vmem:[%s134_s27 + $0x1c] sm:$0xf] %v167_v7  ;;  %v169_v8 = vld [vmem:[%s136_s26 + $0x40] sm:$0xf] }
  0x18   : > { %v171_v9 = vld [vmem:[%s136_s26 + $0x48] sm:$0xf]  ;;  %v173_v10 = vld [vmem:[%s136_s26 + $0x50] sm:$0xf]  ;;  %170 = vst [vmem:[%s134_s27 + $0x20] sm:$0xf] %v169_v8 }
  0x19   : > { %172 = vst [vmem:[%s134_s27 + $0x24] sm:$0xf] %v171_v9  ;;  %174 = vst [vmem:[%s134_s27 + $0x28] sm:$0xf] %v173_v10  ;;  %v175_v11 = vld [vmem:[%s136_s26 + $0x58] sm:$0xf] }
  0x1a   : > { %176 = vst [vmem:[%s134_s27 + $0x2c] sm:$0xf] %v175_v11 }
  0x1b PF: > { %p490_p7 = scmp.ge.s32.totalorder %s595_s14, 1  ;;  %p223_p8 = scmp.lt.s32.totalorder %s595_s14, 3 }
  0x1d   : > { %p224_p9 = pnand %p490_p7, %p223_p8 }
  0x1e   : > { %s230_s28 = sand.u32 (!%p224_p9), 1, %s587_s12  }
  0x1f   : > { %227 = sbr.rel (%p224_p9) target bundleno = 271 (0x10f), region = 69  ;;  %s491_s10 = sshll.u32 (!%p224_p9), %s230_s28, 3 }
  0x20   : > { %s537_s29 = smul.u32 (!%p224_p9), 48, %s230_s28  ;;  %s251_s11 = scalar_lea.vmem (!%p224_p9), [#allocation3], %s491_s10 }
  0x22   : > { %s232_s7 = scalar_lea.vmem (!%p224_p9), [#allocation2], %s537_s29 }
  0x24   : > { %v597_v12 = vmov 0.0   ;;  %vm598_vm0 = vmmov 0   ;;  %v267_v13 = vld [vmem:[%s695_s2] sm:$0xff]  ;;  %v599_v14 = vmov 0   ;;  %v268_v15 = vld [vmem:[%s695_s2 + $0x8] sm:$0xff]  ;;  %vm320_vm1 = vcmask 785408  }
  0x25   : > { %520 = vmatprep.subr.bf16.mxu0 %v597_v12  ;;  %532 = vmatprep.mubr.msk.bf16.mxu0 %vm598_vm0, %v597_v12  ;;  %v566_v16 = vld [vmem:[%s232_s7 + $0x28] sm:$0xff]   ;;  %v567_v17 = vld [vmem:[%s232_s7 + $0x20] sm:$0xff]   ;;  %v568_v18 = vld [vmem:[%s232_s7 + $0x18] sm:$0xff]   ;;  %s503_s17 = sshll.u32 (%p650_p5), %s485_s15, 2 }
  0x26   : > { %565 = vset.pattern.permute.xlu0 %v599_v14  ;;  %521 = vmatpush3.bf16.msra.mxu0 %v566_v16  ;;  %v569_v19 = vld [vmem:[%s232_s7 + $0x10] sm:$0xff]   ;;  %v570_v20 = vld [vmem:[%s232_s7 + $0x8] sm:$0xff]   ;;  %v571_v21 = vld [vmem:[%s232_s7] sm:$0xff]   ;;  %s383_s12 = scalar_lea.vmem (%p650_p5), %s696_s3, %s503_s17 }
  0x27   : > { %271 = vperm.xlu0 %565, %v267_v13   ;;  %522 = vmatprep.subr.bf16.mxu0 %v597_v12  ;;  %v572_v22 = vld [vmem:[%s694_s1] sm:$0xff]  }
  0x2a   : > { %523 = vmatpush3.bf16.msra.mxu0 %v567_v17 }
  0x2b   : > { %276 = vperm.xlu0 %565, %v268_v15   ;;  %524 = vmatprep.subr.bf16.mxu0 %v597_v12 }
  0x2e   : > { %525 = vmatpush3.bf16.msra.mxu0 %v568_v18 }
  0x2f   : > { %526 = vmatprep.subr.bf16.mxu0 %v597_v12 }
  0x32   : > { %527 = vmatpush3.bf16.msra.mxu0 %v569_v19 }
  0x33   : > { %528 = vmatprep.subr.bf16.mxu0 %v597_v12 }
  0x36   : > { %529 = vmatpush3.bf16.msra.mxu0 %v570_v20 }
  0x37   : > { %530 = vmatprep.subr.bf16.mxu0 %v597_v12 }
  0x3a   : > { %531 = vmatpush3.bf16.msra.mxu0 %v571_v21 }
  0x3d   : > { %533 = vmatmul.mubr.msk.bf16.vlgmr.msra.gmra.mxu0 %vm320_vm1, %v572_v22 }
  0xa2   : > { %v272_v23 = vpop.permute.xlu0 %271 }
  0xa6   : > { %v277_v26 = vpop.permute.xlu0 %276 }
  0xfd   : > { %v358_v24 = vpop.f32.mrf.mxu0 }
  0xfe   : > { %v359_v28 = vadd.f32 %v358_v24, %v272_v23 }
  0xff   : > { %v534_v25 = vpop.f32.mrf.mxu0 }
 0x101   : > { %v361_v27 = vpop.f32.mrf.mxu0 }
 0x102   : > { %v362_v29 = vadd.f32 %v361_v27, %v277_v26  ;;  %381 = sbr.rel (!%p650_p5) target bundleno = 271 (0x10f), region = 77 }
 0x103   : > { %v535_v30 = vpop.f32.mrf.mxu0 }
 0x104   : > { %v511_v31 = vpack.c.bf16 %v362_v29, %v359_v28 }
 0x106   : > { %512 = vst [vmem:[%s251_s11] sm:$0xff] %v511_v31  }
 0x10d   : > { %v400_v32 = vld [vmem:[%s251_s11] sm:$0xf]  ;;  %v402_v33 = vld [vmem:[%s251_s11 + $0x4] sm:$0xf] }
 0x10e   : > { %401 = vst [vmem:[%s383_s12] sm:$0xf] %v400_v32  ;;  %403 = vst [vmem:[%s383_s12 + $0x8] sm:$0xf] %v402_v33 }
 0x10f PF: > { %p10_p10 = scmp.ge.s32.totalorder %s637_s16, 4   ;;  %s698_s12 = smov %s591_s13 }
 0x110   : > { %s699_s13 = smov %s648_s19  ;;  %s700_s14 = smov %s637_s16 }
 0x111   :  { %12 = sbr.rel (!%p10_p10) target bundleno = 2 (0x2), region = 149 }

// kernel: cspconv_forward.3
= control target key start
LH: loop header
LB: loop body
LE: loop exit
PB: predicated region body
PF: predicated region fallthrough
CT: control target
= control target key end

     0   :  { %s748_s15 = smov 0   ;;  %s926_s0 = inlined_call_operand.vmem [shape: bf16[16,2,128], index: 0, kind: input, shape index: {}]   ;;  %s927_s1 = inlined_call_operand.vmem [shape: f32[16,1,1], index: 1, kind: input, shape index: {}]   ;;  %s928_s2 = inlined_call_operand.vmem [shape: f32[16,1,1], index: 2, kind: input, shape index: {}]   ;;  %s929_s3 = inlined_call_operand.vmem [shape: f32[2,1,1], index: 3, kind: input, shape index: {}]   ;;  %s930_s4 = inlined_call_operand.vmem [shape: f32[16,2,128], index: 4, kind: output, shape index: {}]  }
   0x1 LB: > { %s754_s16 = sadd.s32 4294967295, %s720_s15   ;;  %p676_p0 = scmp.ge.s32.totalorder %s720_s15, 1  ;;  %s720_s15 = sphi %s748_s15, %s14_s15  }
   0x2   : > { %p190_p1 = scmp.lt.s32.totalorder %s720_s15, 3 }
   0x4   : > { %p191_p2 = pnand %p676_p0, %p190_p1 }
   0x5   : > { %s677_s17 = sshll.u32 (!%p191_p2), %s754_s16, 3  ;;  %p241_p4 = scmp.lt.s32.totalorder (!%p191_p2), %s754_s16, 1 }
   0x6   : > { %194 = sbr.rel (%p191_p2) target bundleno = 417 (0x1a1), region = 36  ;;  %p227_p3 = scmp.lt.s32.totalorder (!%p191_p2), %s677_s17, 15 }
   0xb   : > { %v722_v0 = vmov 0   ;;  %s932_s17 = smov (!%p227_p3, %s677_s17), 15  ;;  %vm266_vm0 = vcmask 1041408   ;;  %s934_s16 = smov (!%p241_p4, %s754_s16), 1 }
   0xc   : > { %711 = vset.pattern.permute.xlu1 %v722_v0  ;;  %710 = vset.pattern.permute.xlu0 %v722_v0  ;;  %s229_s20 = scalar_lea.vmem %s926_s0, %s932_s17  ;;  %s234_s23 = scalar_lea.vmem %s927_s1, %s932_s17 }
   0xd   : > { %v765_v1 = vld [vmem:[%s229_s20] sm:$0x1]  ;;  %v767_v2 = vld [vmem:[%s229_s20 + $0x2] sm:$0x1]  ;;  %v769_v3 = vld [vmem:[%s229_s20 + $0x1] sm:$0x1]  ;;  %s821_s26 = scalar_lea.vmem %s928_s2, %s932_s17  ;;  %s243_s29 = scalar_lea.vmem %s929_s3, %s934_s16 }
   0xe   : > { %v258_v4 = vunpack.c.l.bf16 %v765_v1  ;;  %v260_v5 = vunpack.c.l.bf16 %v767_v2  ;;  %v259_v6 = vunpack.c.l.bf16 %v769_v3  ;;  %v774_v7 = vld [vmem:[%s229_s20 + $0x3] sm:$0x1]  ;;  %v777_v9 = vld [vmem:[%s229_s20 + $0x4] sm:$0x1]  ;;  %v779_v10 = vld [vmem:[%s229_s20 + $0x5] sm:$0x1] }
   0xf   : > { %v261_v8 = vunpack.c.l.bf16 %v774_v7  ;;  %v262_v15 = vunpack.c.l.bf16 %v777_v9  ;;  %v263_v16 = vunpack.c.l.bf16 %v779_v10  ;;  %v795_v17 = vld [vmem:[%s229_s20 + $0x6] sm:$0x1]  ;;  %v797_v18 = vld [vmem:[%s229_s20 + $0x7] sm:$0x1]  ;;  %v683_v25 = vld [vmem:[%s234_s23 + $0x1] ss:$0 sm:$0xff] }
  0x10   : > { %v267_v11 = vsel %vm266_vm0, %v258_v4, 0.0  ;;  %v273_v12 = vsel %vm266_vm0, %v260_v5, 0.0  ;;  %v270_v13 = vsel %vm266_vm0, %v259_v6, 0.0  ;;  %v264_v21 = vunpack.c.l.bf16 %v795_v17  ;;  %v684_v26 = vld [vmem:[%s234_s23 + $0x2] ss:$0 sm:$0xff]  ;;  %s681_s30 = sshll.u32 %s932_s17, 1 }
  0x11   : > { %268 = vadd.xlane.f32.xlu0 %v267_v11  ;;  %274 = vadd.xlane.f32.xlu1 %v273_v12  ;;  %v276_v14 = vsel %vm266_vm0, %v261_v8, 0.0  ;;  %v279_v19 = vsel %vm266_vm0, %v262_v15, 0.0  ;;  %v282_v20 = vsel %vm266_vm0, %v263_v16, 0.0  ;;  %v265_v22 = vunpack.c.l.bf16 %v797_v18  ;;  %v682_v27 = vld [vmem:[%s234_s23] ss:$0 sm:$0xff]  ;;  %s248_s7 = scalar_lea.vmem %s930_s4, %s681_s30 }
  0x12   : > { %v285_v23 = vsel %vm266_vm0, %v264_v21, 0.0  ;;  %v685_v28 = vld [vmem:[%s234_s23 + $0x3] ss:$0 sm:$0xff]  ;;  %v691_v29 = vld [vmem:[%s821_s26 + $0x1] ss:$0 sm:$0xff] }
  0x13   : > { %v288_v24 = vsel %vm266_vm0, %v265_v22, 0.0  ;;  %v686_v30 = vld [vmem:[%s234_s23 + $0x4] ss:$0 sm:$0xff]  ;;  %v693_v31 = vld [vmem:[%s821_s26 + $0x3] ss:$0 sm:$0xff] }
  0x14   : > { %v687_v32 = vld [vmem:[%s234_s23 + $0x5] ss:$0 sm:$0xff]  ;;  %v688_v33 = vld [vmem:[%s234_s23 + $0x6] ss:$0 sm:$0xff]  ;;  %v689_v34 = vld [vmem:[%s234_s23 + $0x7] ss:$0 sm:$0xff] }
  0x15   : > { %271 = vadd.xlane.f32.xlu0 %v270_v13  ;;  %277 = vadd.xlane.f32.xlu1 %v276_v14  ;;  %v690_v35 = vld [vmem:[%s821_s26] ss:$0 sm:$0xff]  ;;  %v692_v36 = vld [vmem:[%s821_s26 + $0x2] ss:$0 sm:$0xff]  ;;  %v694_v37 = vld [vmem:[%s821_s26 + $0x4] ss:$0 sm:$0xff] }
  0x19   : > { %280 = vadd.xlane.f32.xlu0 %v279_v19  ;;  %283 = vadd.xlane.f32.xlu1 %v282_v20  ;;  %v696_v20 = vld [vmem:[%s821_s26 + $0x6] ss:$0 sm:$0xff] }
  0x1d   : > { %286 = vadd.xlane.f32.xlu0 %v285_v23  ;;  %289 = vadd.xlane.f32.xlu1 %v288_v24  ;;  %v697_v23 = vld [vmem:[%s821_s26 + $0x7] ss:$0 sm:$0xff] }
  0x2e   : > { %427 = vperm.xlu1 %711, %v683_v25  }
  0x32   : > { %431 = vperm.xlu1 %711, %v684_v26  }
  0x33   : > { %423 = vperm.xlu0 %710, %v682_v27   ;;  %v698_v27 = vld [vmem:[%s243_s29] ss:$0 sm:$0xff] }
  0x36   : > { %435 = vperm.xlu1 %711, %v685_v28  }
  0x37   : > { %515 = vperm.xlu0 %710, %v691_v29  }
  0x3a   : > { %439 = vperm.xlu1 %711, %v686_v30  }
  0x3b   : > { %523 = vperm.xlu0 %710, %v693_v31  }
  0x3e   : > { %443 = vperm.xlu1 %711, %v687_v32  }
  0x42   : > { %447 = vperm.xlu1 %711, %v688_v33  }
  0x46   : > { %451 = vperm.xlu1 %711, %v689_v34  }
  0x4a   : > { %511 = vperm.xlu1 %711, %v690_v35  }
  0x4e   : > { %519 = vperm.xlu1 %711, %v692_v36  }
  0x52   : > { %527 = vperm.xlu1 %711, %v694_v37  }
  0x9a   : > { %v269_v38 = vpop.xlane.xlu0 %268  ;;  %v275_v39 = vpop.xlane.xlu1 %274 }
  0x9b   : > { %v291_v42 = vsel %vm266_vm0, %v269_v38, 0.0  ;;  %v294_v45 = vsel %vm266_vm0, %v275_v39, 0.0 }
  0x9e   : > { %v272_v40 = vpop.xlane.xlu0 %271  ;;  %v278_v41 = vpop.xlane.xlu1 %277 }
  0x9f   : > { %v292_v43 = vsel %vm266_vm0, %v272_v40, 0.0  ;;  %v296_v46 = vsel %vm266_vm0, %v278_v41, 0.0 }
  0xa0   : > { %v293_v44 = vadd.f32 %v292_v43, %v291_v42 }
  0xa2   : > { %v295_v47 = vadd.f32 %v294_v45, %v293_v44  ;;  %v281_v48 = vpop.xlane.xlu0 %280  ;;  %v284_v49 = vpop.xlane.xlu1 %283 }
  0xa3   : > { %v298_v50 = vsel %vm266_vm0, %v281_v48, 0.0  ;;  %v300_v52 = vsel %vm266_vm0, %v284_v49, 0.0 }
  0xa4   : > { %v297_v51 = vadd.f32 %v296_v46, %v295_v47 }
  0xa6   : > { %v299_v53 = vadd.f32 %v298_v50, %v297_v51  ;;  %v287_v54 = vpop.xlane.xlu0 %286  ;;  %v290_v55 = vpop.xlane.xlu1 %289 }
  0xa7   : > { %v302_v56 = vsel %vm266_vm0, %v287_v54, 0.0  ;;  %v304_v58 = vsel %vm266_vm0, %v290_v55, 0.0 }
  0xa8   : > { %v301_v57 = vadd.f32 %v300_v52, %v299_v53 }
  0xaa   : > { %v303_v59 = vadd.f32 %v302_v56, %v301_v57  ;;  %v428_v28 = vpop.permute.xlu1 %427 }
  0xac   : > { %v305_v60 = vadd.f32 %v304_v58, %v303_v59 }
  0xae   : > { %v307_v61 = vmul.f32 0.0009765625, %v305_v60  ;;  %v432_v29 = vpop.permute.xlu1 %431 }
  0xb0   : > { %v838_v62 = vsub.f32 %v259_v6, %v307_v61  ;;  %v842_v63 = vsub.f32 %v258_v4, %v307_v61  ;;  %v846_v0 = vsub.f32 %v261_v8, %v307_v61  ;;  %v850_v11 = vsub.f32 %v260_v5, %v307_v61 }
  0xb1   : > { %v858_v6 = vsub.f32 %v263_v16, %v307_v61  ;;  %v862_v1 = vsub.f32 %v262_v15, %v307_v61  ;;  %v872_v8 = vsub.f32 %v264_v21, %v307_v61  ;;  %v695_v21 = vld [vmem:[%s821_s26 + $0x5] ss:$0 sm:$0xff]  ;;  %v315_v24 = vsub.f32 %v265_v22, %v307_v61  ;;  %v424_v22 = vpop.permute.xlu0 %423 }
  0xb2   : > { %v317_v12 = vmul.f32 %v838_v62, %v838_v62  ;;  %v316_v3 = vmul.f32 %v842_v63, %v842_v63  ;;  %v319_v5 = vmul.f32 %v846_v0, %v846_v0  ;;  %v318_v7 = vmul.f32 %v850_v11, %v850_v11  ;;  %v436_v30 = vpop.permute.xlu1 %435 }
  0xb3   : > { %v321_v13 = vmul.f32 %v858_v6, %v858_v6  ;;  %v320_v14 = vmul.f32 %v862_v1, %v862_v1  ;;  %v322_v17 = vmul.f32 %v872_v8, %v872_v8  ;;  %v323_v25 = vmul.f32 %v315_v24, %v315_v24 }
  0xb4   : > { %v327_v4 = vsel %vm266_vm0, %v317_v12, 0.0  ;;  %v324_v2 = vsel %vm266_vm0, %v316_v3, 0.0  ;;  %v333_v9 = vsel %vm266_vm0, %v319_v5, 0.0  ;;  %v330_v10 = vsel %vm266_vm0, %v318_v7, 0.0 }
  0xb5   : > { %328 = vadd.xlane.f32.xlu1 %v327_v4  ;;  %325 = vadd.xlane.f32.xlu0 %v324_v2  ;;  %v339_v15 = vsel %vm266_vm0, %v321_v13, 0.0  ;;  %v336_v16 = vsel %vm266_vm0, %v320_v14, 0.0  ;;  %v342_v19 = vsel %vm266_vm0, %v322_v17, 0.0  ;;  %v345_v26 = vsel %vm266_vm0, %v323_v25, 0.0  ;;  %v516_v35 = vpop.permute.xlu0 %515 }
  0xb6   : > { %v440_v31 = vpop.permute.xlu1 %439 }
  0xb9   : > { %334 = vadd.xlane.f32.xlu1 %v333_v9  ;;  %331 = vadd.xlane.f32.xlu0 %v330_v10  ;;  %v524_v37 = vpop.permute.xlu0 %523 }
  0xba   : > { %v444_v32 = vpop.permute.xlu1 %443 }
  0xbd   : > { %340 = vadd.xlane.f32.xlu1 %v339_v15  ;;  %337 = vadd.xlane.f32.xlu0 %v336_v16 }
  0xbe   : > { %v448_v33 = vpop.permute.xlu1 %447 }
  0xc1   : > { %343 = vadd.xlane.f32.xlu0 %v342_v19 }
  0xc2   : > { %v452_v18 = vpop.permute.xlu1 %451 }
  0xc6   : > { %v512_v34 = vpop.permute.xlu1 %511 }
  0xca   : > { %v520_v36 = vpop.permute.xlu1 %519 }
  0xce   : > { %535 = vperm.xlu1 %711, %v696_v20   ;;  %v528_v38 = vpop.permute.xlu1 %527 }
  0xd7   : > { %531 = vperm.xlu0 %710, %v695_v21  }
  0xdb   : > { %539 = vperm.xlu0 %710, %v697_v23  }
  0xf2   : > { %346 = vadd.xlane.f32.xlu1 %v345_v26 }
 0x103   : > { %565 = vperm.xlu1 %711, %v698_v27  }
 0x13e   : > { %v326_v39 = vpop.xlane.xlu0 %325  ;;  %v329_v40 = vpop.xlane.xlu1 %328 }
 0x13f   : > { %v349_v42 = vsel %vm266_vm0, %v329_v40, 0.0  ;;  %v348_v43 = vsel %vm266_vm0, %v326_v39, 0.0 }
 0x140   : > { %v350_v45 = vadd.f32 %v349_v42, %v348_v43 }
 0x142   : > { %v332_v41 = vpop.xlane.xlu0 %331  ;;  %v335_v46 = vpop.xlane.xlu1 %334 }
 0x143   : > { %v351_v44 = vsel %vm266_vm0, %v332_v41, 0.0  ;;  %v353_v49 = vsel %vm266_vm0, %v335_v46, 0.0 }
 0x144   : > { %v352_v47 = vadd.f32 %v351_v44, %v350_v45 }
 0x146   : > { %v338_v48 = vpop.xlane.xlu0 %337  ;;  %v354_v50 = vadd.f32 %v353_v49, %v352_v47  ;;  %v341_v52 = vpop.xlane.xlu1 %340 }
 0x147   : > { %v355_v51 = vsel %vm266_vm0, %v338_v48, 0.0  ;;  %v357_v55 = vsel %vm266_vm0, %v341_v52, 0.0 }
 0x148   : > { %v356_v53 = vadd.f32 %v355_v51, %v354_v50 }
 0x14a   : > { %v344_v54 = vpop.xlane.xlu0 %343  ;;  %v536_v56 = vpop.permute.xlu1 %535  ;;  %v358_v57 = vadd.f32 %v357_v55, %v356_v53 }
 0x14b   : > { %v359_v58 = vsel %vm266_vm0, %v344_v54, 0.0 }
 0x14c   : > { %v360_v59 = vadd.f32 %v359_v58, %v358_v57 }
 0x152   : > { %v532_v2 = vpop.permute.xlu0 %531 }
 0x156   : > { %v540_v27 = vpop.permute.xlu0 %539 }
 0x17b   : > { %v347_v60 = vpop.xlane.xlu1 %346 }
 0x17c   : > { %v361_v61 = vsel %vm266_vm0, %v347_v60, 0.0 }
 0x17d   : > { %v362_v12 = vadd.f32 %v361_v61, %v360_v59 }
 0x17f   : > { %v363_v3 = vmul.f32 0.0009765625, %v362_v12 }
 0x181   : > { %v364_v4 = vadd.f32 1e-08, %v363_v3 }
 0x183   : > { %712 = vrsqrt.f32 %v364_v4 }
 0x190   : > { %v713_v5 = vpop.eup %712 }
 0x191   : > { %v366_v7 = vmul.f32 %v713_v5, %v842_v63  ;;  %v367_v9 = vmul.f32 %v713_v5, %v838_v62  ;;  %v368_v10 = vmul.f32 %v713_v5, %v850_v11  ;;  %v369_v13 = vmul.f32 %v713_v5, %v846_v0 }
 0x192   : > { %v370_v14 = vmul.f32 %v713_v5, %v862_v1  ;;  %v371_v15 = vmul.f32 %v713_v5, %v858_v6  ;;  %v372_v16 = vmul.f32 %v713_v5, %v872_v8  ;;  %v373_v17 = vmul.f32 %v713_v5, %v315_v24  ;;  %v566_v8 = vpop.permute.xlu1 %565 }
 0x193   : > { %v454_v19 = vmul.f32 %v424_v22, %v366_v7  ;;  %v455_v20 = vmul.f32 %v428_v28, %v367_v9  ;;  %v456_v21 = vmul.f32 %v432_v29, %v368_v10  ;;  %v457_v23 = vmul.f32 %v436_v30, %v369_v13 }
 0x194   : > { %v458_v25 = vmul.f32 %v440_v31, %v370_v14  ;;  %v459_v63 = vmul.f32 %v444_v32, %v371_v15  ;;  %v460_v26 = vmul.f32 %v448_v33, %v372_v16  ;;  %v461_v62 = vmul.f32 %v452_v18, %v373_v17 }
 0x195   : > { %v542_v11 = vadd.f32 %v512_v34, %v454_v19  ;;  %v543_v39 = vadd.f32 %v516_v35, %v455_v20  ;;  %v544_v0 = vadd.f32 %v520_v36, %v456_v21  ;;  %v545_v40 = vadd.f32 %v524_v37, %v457_v23 }
 0x196   : > { %v546_v1 = vadd.f32 %v528_v38, %v458_v25  ;;  %v547_v6 = vadd.f32 %v532_v2, %v459_v63  ;;  %v548_v41 = vadd.f32 %v536_v56, %v460_v26  ;;  %v549_v42 = vadd.f32 %v540_v27, %v461_v62 }
 0x197   : > { %vm551_vm1 = vcmp.gt.f32.partialorder %v542_v11, 0.0  ;;  %vm552_vm2 = vcmp.gt.f32.partialorder %v543_v39, 0.0  ;;  %vm553_vm3 = vcmp.gt.f32.partialorder %v544_v0, 0.0  ;;  %vm554_vm4 = vcmp.gt.f32.partialorder %v545_v40, 0.0 }
 0x198   : > { %vm555_vm5 = vcmp.gt.f32.partialorder %v546_v1, 0.0  ;;  %vm556_vm6 = vcmp.gt.f32.partialorder %v547_v6, 0.0  ;;  %vm557_vm7 = vcmp.gt.f32.partialorder %v548_v41, 0.0  ;;  %vm558_vm8 = vcmp.gt.f32.partialorder %v549_v42, 0.0 }
 0x199   : > { %v568_v24 = vmul.f32 %v566_v8, %v542_v11  ;;  %v569_v28 = vmul.f32 %v566_v8, %v543_v39  ;;  %v570_v29 = vmul.f32 %v566_v8, %v544_v0  ;;  %v571_v30 = vmul.f32 %v566_v8, %v545_v40 }
 0x19a   : > { %v572_v31 = vmul.f32 %v566_v8, %v546_v1  ;;  %v573_v32 = vmul.f32 %v566_v8, %v547_v6  ;;  %v574_v33 = vmul.f32 %v566_v8, %v548_v41  ;;  %v575_v18 = vmul.f32 %v566_v8, %v549_v42 }
 0x19b   : > { %v576_v22 = vsel %vm551_vm1, %v542_v11, %v568_v24  ;;  %v577_v34 = vsel %vm552_vm2, %v543_v39, %v569_v28  ;;  %v578_v35 = vsel %vm553_vm3, %v544_v0, %v570_v29  ;;  %v579_v36 = vsel %vm554_vm4, %v545_v40, %v571_v30 }
 0x19c   : > { %v580_v37 = vsel %vm555_vm5, %v546_v1, %v572_v31  ;;  %v581_v38 = vsel %vm556_vm6, %v547_v6, %v573_v32  ;;  %v582_v43 = vsel %vm557_vm7, %v548_v41, %v574_v33  ;;  %v583_v44 = vsel %vm558_vm8, %v549_v42, %v575_v18  ;;  %584 = vst [vmem:[%s248_s7] sm:$0x3] %v576_v22 }
 0x19d   : > { %585 = vst [vmem:[%s248_s7 + $0x2] sm:$0x3] %v577_v34  ;;  %586 = vst [vmem:[%s248_s7 + $0x4] sm:$0x3] %v578_v35 }
 0x19e   : > { %587 = vst [vmem:[%s248_s7 + $0x6] sm:$0x3] %v579_v36  ;;  %588 = vst [vmem:[%s248_s7 + $0x8] sm:$0x3] %v580_v37 }
 0x19f   : > { %589 = vst [vmem:[%s248_s7 + $0xa] sm:$0x3] %v581_v38  ;;  %590 = vst [vmem:[%s248_s7 + $0xc] sm:$0x3] %v582_v43 }
 0x1a0   : > { %591 = vst [vmem:[%s248_s7 + $0xe] sm:$0x3] %v583_v44 }
 0x1a1 PF: > { %s14_s15 = sadd.s32 1, %s720_s15  }
 0x1a2   : > { %p11_p5 = scmp.ge.s32.totalorder %s14_s15, 4  }
 0x1a4   :  { %13 = sbr.rel (!%p11_p5) target bundleno = 1 (0x1), region = 75 }

</bundles_post_ra>
